<compile_context>
chip_gen: v5e
topology: v5e:2x2
jax: 0.10.0
libtpu: 0.0.40
codegen_flags: <defaults>
</compile_context>

<pallas_src>
import numpy as np
import jax
import jax.numpy as jnp
from jax import lax
from jax.experimental import pallas as pl
from jax.experimental.pallas import tpu as pltpu

# ----------------------------- "DictConfig" args ------------------------------
B = 2                       # batch
C = 8                       # args.num_channels
T = 64                      # time length T
CHANNELS_USE = [0, 1, 2, 3, 5, 6]   # args.channels_use
F1 = 4                      # args.F1
D = 2                       # args.D
DF1 = D * F1
F2 = 8                      # args.F2
K1 = 15                     # args.k1  (odd -> symmetric 'same' padding)
K2 = 7                      # args.k2
POOL1 = 4                   # args.p1
POOL2 = 4                   # args.p2
NCLASS = 4                  # args.n_class
HILBERT = False             # args.hilbert_transform

LEFT1 = (K1 - 1) // 2
RIGHT1 = (K1 - 1) - LEFT1
LEFT2 = (K2 - 1) // 2
RIGHT2 = (K2 - 1) - LEFT2
T1 = T // POOL1
T2 = T1 // POOL2
NDIM = F2 * 1 * T2          # self.n_dim
TP1 = T + K1 - 1            # padded time length used by the Toeplitz conv
TP1_PAD = ((TP1 + 7) // 8) * 8       # round up so B*TP1_PAD is sublane-aligned
PAD_EXTRA = TP1_PAD - TP1
NB = max(DF1, F2, NCLASS)   # rows of the packed bias array


# --------------------------------- kernel -------------------------------------
def eegnet_kernel(x_ref, wtoep_ref, w2blk_ref, q_ref, msel_ref, w3ps_ref,
                  ssum_ref, alt_ref, me_ref, rs_ref, cs_ref, bias_ref,
                  out_ref, scr):
    bias = bias_ref[...]                                     # (NB, 3)

    # ---- conv1 ('same' temporal conv) as ONE Toeplitz matmul --------------------
    # x_ref: (C, B*TP1_PAD), wtoep: (B*TP1_PAD, F1*B*T) -> y1[c, f*B*T + b*T + t]
    y1 = jnp.dot(x_ref[...], wtoep_ref[...],
                 preferred_element_type=jnp.float32)          # (C, F1*B*T)

    # restack (C, F1*B*T) -> (F1*C, B*T): F1 copies, all slices are 128-lane
    # aligned, stores at sublane offsets that are multiples of 8 (unmasked).
    for f in range(F1):
        scr[f * C:(f + 1) * C, :] = y1[:, f * (B * T):(f + 1) * (B * T)]

    # ---- conv2 (grouped spatial conv) as one block-diagonal matmul --------------
    # mask, BN1 scale and BN2 scale are folded into w2blk; shifts into bias col 0.
    y2 = jnp.dot(w2blk_ref[...], scr[...],
                 preferred_element_type=jnp.float32)          # (DF1, B*T) = (8, 128)
    y2 = y2 + bias[:DF1, 0:1]
    y2 = jnp.where(y2 > 0, y2, jnp.exp(jnp.minimum(y2, 0.0)) - 1.0)   # ELU
    # (Dropout = identity in eval mode)

    # ---- avgpool1 + depthwise conv3 folded into Q -------------------------------
    # Q expands the lane axis over the DF1 output rows; the per-row depthwise
    # filter is then selected with a precomputed 0/1 mask, the pointwise 1x1 conv
    # (BN3 scale folded) is a left matmul, and Ssum collapses the lane blocks.
    r = jnp.dot(y2, q_ref[...], preferred_element_type=jnp.float32)   # (DF1, DF1*B*T1)
    r = r * msel_ref[...]
    y3 = jnp.dot(w3ps_ref[...], r, preferred_element_type=jnp.float32)  # (F2, DF1*B*T1)
    y3 = jnp.dot(y3, ssum_ref[...], preferred_element_type=jnp.float32) # (F2, B*T1)
    y3 = y3 + bias[:F2, 1:2]
    y3 = jnp.where(y3 > 0, y3, jnp.exp(jnp.minimum(y3, 0.0)) - 1.0)     # ELU

    # ---- avgpool2 + flatten + Linear, folded: out^T = RS @ ((ALt@y3)*Me) @ CS + b
    tq = jnp.dot(alt_ref[...], y3, preferred_element_type=jnp.float32)  # (NCLASS*T1, B*T1)
    tq = tq * me_ref[...]
    o = jnp.dot(rs_ref[...], tq, preferred_element_type=jnp.float32)    # (NCLASS, B*T1)
    o = jnp.dot(o, cs_ref[...], preferred_element_type=jnp.float32)     # (NCLASS, B)
    out_ref[...] = o + bias[:NCLASS, 2:3]


# --------------------------------- wrapper -------------------------------------
def eegnet_forward_pallas(x, consts):
    """x: (B, 1, C, T) float32 (NCHW, like PyTorch)."""
    x2 = x[:, 0, :, :]                                            # (B, C, T)
    xpad = jnp.pad(x2, ((0, 0), (0, 0), (LEFT1, RIGHT1 + PAD_EXTRA)))  # (B, C, TP1_PAD)
    xp = jnp.transpose(xpad, (1, 0, 2)).reshape(C, B * TP1_PAD)   # (C, B*TP1_PAD)

    shapes = [
        (C, B * TP1_PAD),        # x
        (B * TP1_PAD, F1 * B * T),  # conv1 Toeplitz
        (DF1, F1 * C),           # conv2 block-diagonal
        (B * T, DF1 * B * T1),   # pool1 + depthwise conv3
        (DF1, DF1 * B * T1),     # row/lane-block select mask
        (F2, DF1),               # pointwise conv (s3 folded)
        (DF1 * B * T1, B * T1),  # lane-block sum
        (NCLASS * T1, F2),       # pool2 + classifier weight (q-contraction)
        (NCLASS * T1, B * T1),   # diag-select mask
        (NCLASS, NCLASS * T1),   # row-block sum
        (B * T1, B),             # lane-block sum
        (NB, 3),                 # packed biases (b2_eff, b3, bcls)
    ]
    outT = pl.pallas_call(
        eegnet_kernel,
        out_shape=jax.ShapeDtypeStruct((NCLASS, B), jnp.float32),
        grid=(1,),
        in_specs=[pl.BlockSpec(s, lambda i: (0, 0)) for s in shapes],
        out_specs=pl.BlockSpec((NCLASS, B), lambda i: (0, 0)),
        scratch_shapes=[pltpu.VMEM((F1 * C, B * T), jnp.float32)],
        compiler_params=pltpu.CompilerParams(
            dimension_semantics=("arbitrary",)),
    )(xp, consts['wtoep'], consts['w2blk'], consts['q'], consts['msel'],
      consts['w3ps'], consts['ssum'], consts['alt'], consts['me'],
      consts['rs'], consts['cs'], consts['bias'])
    return outT.T                                             # (B, NCLASS)


# ------------------------- offline constant folding ----------------------------
def build_kernel_consts(p):
    w1 = np.asarray(p['w1']); s1 = np.asarray(p['s1']); b1 = np.asarray(p['b1'])
    w2 = np.asarray(p['w2']); s2 = np.asarray(p['s2']); b2 = np.asarray(p['b2'])
    w3d = np.asarray(p['w3d']); w3p = np.asarray(p['w3p'])
    s3 = np.asarray(p['s3']); b3 = np.asarray(p['b3'])
    wcls = np.asarray(p['wcls']); bcls = np.asarray(p['bcls'])
    mask = np.asarray(p['mask'])

    # conv1 Toeplitz expanded over (f, batch): wtoep[b*TP1_PAD+tp, f*B*T + b*T + t]
    rows = np.arange(B * TP1_PAD); cols = np.arange(F1 * B * T)
    b_r, tp = rows // TP1_PAD, rows % TP1_PAD
    f_c = cols // (B * T); b_c = (cols % (B * T)) // T; t_c = cols % T
    j = tp[:, None] - t_c[None, :]
    valid = (b_r[:, None] == b_c[None, :]) & (j >= 0) & (j < K1)
    wtoep = np.where(valid, w1[f_c[None, :], np.clip(j, 0, K1 - 1)], 0.0)

    # conv2 block-diagonal with mask, s1, s2 folded in
    fm = np.arange(DF1) // D
    w2blk = np.zeros((DF1, F1 * C), np.float64)
    for m in range(DF1):
        w2blk[m, fm[m] * C:(fm[m] + 1) * C] = w2[m] * mask * s1[fm[m]] * s2[m]
    # conv2 of the (unmasked) BN1 shift is a per-row constant -> fold into bias
    b2e = b2 + s2 * b1[fm] * w2.sum(axis=1)

    # avgpool1 + depthwise conv3 (per-output-row filter, expanded on lanes)
    rows = np.arange(B * T); cols = np.arange(DF1 * B * T1)
    b_r, t = rows // T, rows % T
    m_c = cols // (B * T1); b_c = (cols % (B * T1)) // T1; t1_c = cols % T1
    jj = (t // POOL1)[:, None] - t1_c[None, :] + LEFT2
    valid = (b_r[:, None] == b_c[None, :]) & (jj >= 0) & (jj < K2)
    qmat = np.where(valid, w3d[m_c[None, :], np.clip(jj, 0, K2 - 1)] / POOL1, 0.0)

    msel = (np.arange(DF1 * B * T1)[None, :] // (B * T1)
            == np.arange(DF1)[:, None]).astype(np.float64)
    ssum = (np.arange(DF1 * B * T1)[:, None] % (B * T1)
            == np.arange(B * T1)[None, :]).astype(np.float64)
    w3ps = w3p * s3[:, None]

    # avgpool2 + flatten (F2-major, T2-minor) + classifier:
    # A[q, t1, k] = wcls[k, q*T2 + t1//POOL2] / POOL2, laid out as ALt[(k,t1), q]
    r_idx = np.arange(NCLASS * T1)
    k_r, t1_r = r_idx // T1, r_idx % T1
    alt = np.zeros((NCLASS * T1, F2), np.float64)
    for q in range(F2):
        alt[:, q] = wcls[k_r, q * T2 + t1_r // POOL2] / POOL2
    me = (np.arange(NCLASS * T1)[:, None] % T1
          == np.arange(B * T1)[None, :] % T1).astype(np.float64)
    rs = (np.arange(NCLASS * T1)[None, :] // T1
          == np.arange(NCLASS)[:, None]).astype(np.float64)
    cs = (np.arange(B * T1)[:, None] // T1
          == np.arange(B)[None, :]).astype(np.float64)

    bias = np.zeros((NB, 3), np.float64)
    bias[:DF1, 0] = b2e
    bias[:F2, 1] = b3
    bias[:NCLASS, 2] = bcls

    f32 = lambda a: jnp.asarray(a, jnp.float32)
    return dict(wtoep=f32(wtoep), w2blk=f32(w2blk), q=f32(qmat), msel=f32(msel),
                w3ps=f32(w3ps), ssum=f32(ssum), alt=f32(alt), me=f32(me),
                rs=f32(rs), cs=f32(cs), bias=f32(bias))


# ----------------------------- deterministic params ----------------------------
def init_params(key):
    ks = jax.random.split(key, 20)

    def bn_fold(kg, kb, km, kv, n):
        gamma = 1.0 + 0.1 * jax.random.normal(kg, (n,))
        beta = 0.1 * jax.random.normal(kb, (n,))
        mean = 0.1 * jax.random.normal(km, (n,))
        var = 1.0 + 0.1 * jnp.abs(jax.random.normal(kv, (n,)))
        scale = gamma / jnp.sqrt(var + 1e-5)
        shift = beta - mean * scale
        return scale.astype(jnp.float32), shift.astype(jnp.float32)

    w1 = (0.3 * jax.random.normal(ks[0], (F1, K1))).astype(jnp.float32)
    s1, b1 = bn_fold(ks[1], ks[2], ks[3], ks[4], F1)
    w2 = (0.3 * jax.random.normal(ks[5], (DF1, C))).astype(jnp.float32)
    s2, b2 = bn_fold(ks[6], ks[7], ks[8], ks[9], DF1)
    w3d = (0.3 * jax.random.normal(ks[10], (DF1, K2))).astype(jnp.float32)
    w3p = (0.3 * jax.random.normal(ks[11], (F2, DF1))).astype(jnp.float32)
    s3, b3 = bn_fold(ks[12], ks[13], ks[14], ks[15], F2)
    wcls = (0.2 * jax.random.normal(ks[16], (NCLASS, NDIM))).astype(jnp.float32)
    bcls = (0.1 * jax.random.normal(ks[17], (NCLASS,))).astype(jnp.float32)
    mask = jnp.zeros((C,), jnp.float32).at[jnp.array(CHANNELS_USE)].set(1.0)

    return dict(w1=w1, s1=s1, b1=b1, w2=w2, s2=s2, b2=b2,
                w3d=w3d, w3p=w3p, s3=s3, b3=b3,
                wcls=wcls, bcls=bcls, mask=mask)


# ------------------------------ plain-JAX reference -----------------------------
def eegnet_forward_reference(x, p):
    hi = lax.Precision.HIGHEST
    mask4 = p['mask'].reshape(1, 1, C, 1)
    xm = x * mask4
    y = lax.conv_general_dilated(xm, p['w1'].reshape(F1, 1, 1, K1), (1, 1),
                                 padding=((0, 0), (LEFT1, RIGHT1)),
                                 dimension_numbers=('NCHW', 'OIHW', 'NCHW'),
                                 precision=hi)
    y = y * p['s1'].reshape(1, F1, 1, 1) + p['b1'].reshape(1, F1, 1, 1)
    y = lax.conv_general_dilated(y, p['w2'].reshape(DF1, 1, C, 1), (1, 1),
                                 padding=((0, 0), (0, 0)),
                                 dimension_numbers=('NCHW', 'OIHW', 'NCHW'),
                                 feature_group_count=F1, precision=hi)
    y = y * p['s2'].reshape(1, DF1, 1, 1) + p['b2'].reshape(1, DF1, 1, 1)
    y = jnp.where(y > 0, y, jnp.exp(jnp.minimum(y, 0.0)) - 1.0)
    y = y.reshape(B, DF1, 1, T1, POOL1).mean(-1)
    y = lax.conv_general_dilated(y, p['w3d'].reshape(DF1, 1, 1, K2), (1, 1),
                                 padding=((0, 0), (LEFT2, RIGHT2)),
                                 dimension_numbers=('NCHW', 'OIHW', 'NCHW'),
                                 feature_group_count=DF1, precision=hi)
    y = jnp.einsum('qo,bowt->bqwt', p['w3p'], y, precision=hi)
    y = y * p['s3'].reshape(1, F2, 1, 1) + p['b3'].reshape(1, F2, 1, 1)
    y = jnp.where(y > 0, y, jnp.exp(jnp.minimum(y, 0.0)) - 1.0)
    y = y.reshape(B, F2, 1, T2, POOL2).mean(-1)
    flat = y.reshape(B, NDIM)
    return jnp.dot(flat, p['wcls'].T, precision=hi) + p['bcls']


# ----------------------------------- main ---------------------------------------
if __name__ == "__main__":
    key = jax.random.PRNGKey(0)
    kx, kp = jax.random.split(key)
    params = init_params(kp)
    consts = build_kernel_consts(params)
    x = jax.random.normal(kx, (B, 1, C, T), dtype=jnp.float32)

    out = eegnet_forward_pallas(x, consts)
    out = jax.block_until_ready(out)

    ref = eegnet_forward_reference(x, params)
    np.testing.assert_allclose(np.asarray(out), np.asarray(ref), rtol=2e-2, atol=2e-2)

    print("KERNEL_OK")
</pallas_src>

<mosaic_0001>
module attributes {stable_mosaic.version = 11 : i64} {
  func.func @eegnet_kernel(%arg0: i32, %arg1: memref<8x160xf32, #tpu.memory_space<vmem>>, %arg2: memref<160x512xf32, #tpu.memory_space<vmem>>, %arg3: memref<8x32xf32, #tpu.memory_space<vmem>>, %arg4: memref<128x256xf32, #tpu.memory_space<vmem>>, %arg5: memref<8x256xf32, #tpu.memory_space<vmem>>, %arg6: memref<8x8xf32, #tpu.memory_space<vmem>>, %arg7: memref<256x32xf32, #tpu.memory_space<vmem>>, %arg8: memref<64x8xf32, #tpu.memory_space<vmem>>, %arg9: memref<64x32xf32, #tpu.memory_space<vmem>>, %arg10: memref<4x64xf32, #tpu.memory_space<vmem>>, %arg11: memref<32x2xf32, #tpu.memory_space<vmem>>, %arg12: memref<8x3xf32, #tpu.memory_space<vmem>>, %arg13: memref<4x2xf32, #tpu.memory_space<vmem>>, %arg14: memref<32x128xf32, #tpu.memory_space<vmem>>) attributes {dimension_semantics = [#tpu.dimension_semantics<arbitrary>], iteration_bounds = array<i64: 1>, scalar_prefetch = 0 : i64, scratch_operands = 1 : i64, tpu.core_type = #tpu.core_type<tc>, window_params = [{pipeline_mode = #tpu.pipeline_mode<synchronous>, transform_indices = @transform_0, window_bounds = array<i64: 8, 160>}, {pipeline_mode = #tpu.pipeline_mode<synchronous>, transform_indices = @transform_1, window_bounds = array<i64: 160, 512>}, {pipeline_mode = #tpu.pipeline_mode<synchronous>, transform_indices = @transform_2, window_bounds = array<i64: 8, 32>}, {pipeline_mode = #tpu.pipeline_mode<synchronous>, transform_indices = @transform_3, window_bounds = array<i64: 128, 256>}, {pipeline_mode = #tpu.pipeline_mode<synchronous>, transform_indices = @transform_4, window_bounds = array<i64: 8, 256>}, {pipeline_mode = #tpu.pipeline_mode<synchronous>, transform_indices = @transform_5, window_bounds = array<i64: 8, 8>}, {pipeline_mode = #tpu.pipeline_mode<synchronous>, transform_indices = @transform_6, window_bounds = array<i64: 256, 32>}, {pipeline_mode = #tpu.pipeline_mode<synchronous>, transform_indices = @transform_7, window_bounds = array<i64: 64, 8>}, {pipeline_mode = #tpu.pipeline_mode<synchronous>, transform_indices = @transform_8, window_bounds = array<i64: 64, 32>}, {pipeline_mode = #tpu.pipeline_mode<synchronous>, transform_indices = @transform_9, window_bounds = array<i64: 4, 64>}, {pipeline_mode = #tpu.pipeline_mode<synchronous>, transform_indices = @transform_10, window_bounds = array<i64: 32, 2>}, {pipeline_mode = #tpu.pipeline_mode<synchronous>, transform_indices = @transform_11, window_bounds = array<i64: 8, 3>}, {pipeline_mode = #tpu.pipeline_mode<synchronous>, transform_indices = @transform_12, window_bounds = array<i64: 4, 2>}]} {
    %c0 = arith.constant 0 : index
    %c0_0 = arith.constant 0 : index
    %0 = vector.load %arg12[%c0, %c0_0] : memref<8x3xf32, #tpu.memory_space<vmem>>, vector<8x3xf32>
    %c0_1 = arith.constant 0 : index
    %c0_2 = arith.constant 0 : index
    %1 = vector.load %arg1[%c0_1, %c0_2] : memref<8x160xf32, #tpu.memory_space<vmem>>, vector<8x160xf32>
    %c0_3 = arith.constant 0 : index
    %c0_4 = arith.constant 0 : index
    %2 = vector.load %arg2[%c0_3, %c0_4] : memref<160x512xf32, #tpu.memory_space<vmem>>, vector<160x512xf32>
    %cst = arith.constant dense<0.000000e+00> : vector<8x512xf32>
    %3 = tpu.matmul %1, %2, %cst {dimension_numbers = #tpu.dot_dimension_numbers<[1], [0], [0], [1], [0, 0, 1, 1], [], []>} : vector<8x160xf32>, vector<160x512xf32>, vector<8x512xf32> -> vector<8x512xf32>
    %4 = vector.extract_strided_slice %3 {offsets = [0, 0], sizes = [8, 128], strides = [1, 1]} : vector<8x512xf32> to vector<8x128xf32>
    %c0_5 = arith.constant 0 : index
    %c0_6 = arith.constant 0 : index
    %5 = vector.load %arg14[%c0_5, %c0_6] : memref<32x128xf32, #tpu.memory_space<vmem>>, vector<8x128xf32>
    tpu.vector_store %arg14[%c0_5, %c0_6], %4 {strides = array<i32>} : memref<32x128xf32, #tpu.memory_space<vmem>>, vector<8x128xf32>,
    %6 = vector.extract_strided_slice %3 {offsets = [0, 128], sizes = [8, 128], strides = [1, 1]} : vector<8x512xf32> to vector<8x128xf32>
    %c8 = arith.constant 8 : index
    %c0_7 = arith.constant 0 : index
    %7 = vector.load %arg14[%c8, %c0_7] : memref<32x128xf32, #tpu.memory_space<vmem>>, vector<8x128xf32>
    tpu.vector_store %arg14[%c8, %c0_7], %6 {strides = array<i32>} : memref<32x128xf32, #tpu.memory_space<vmem>>, vector<8x128xf32>,
    %8 = vector.extract_strided_slice %3 {offsets = [0, 256], sizes = [8, 128], strides = [1, 1]} : vector<8x512xf32> to vector<8x128xf32>
    %c16 = arith.constant 16 : index
    %c0_8 = arith.constant 0 : index
    %9 = vector.load %arg14[%c16, %c0_8] : memref<32x128xf32, #tpu.memory_space<vmem>>, vector<8x128xf32>
    tpu.vector_store %arg14[%c16, %c0_8], %8 {strides = array<i32>} : memref<32x128xf32, #tpu.memory_space<vmem>>, vector<8x128xf32>,
    %10 = vector.extract_strided_slice %3 {offsets = [0, 384], sizes = [8, 128], strides = [1, 1]} : vector<8x512xf32> to vector<8x128xf32>
    %c24 = arith.constant 24 : index
    %c0_9 = arith.constant 0 : index
    %11 = vector.load %arg14[%c24, %c0_9] : memref<32x128xf32, #tpu.memory_space<vmem>>, vector<8x128xf32>
    tpu.vector_store %arg14[%c24, %c0_9], %10 {strides = array<i32>} : memref<32x128xf32, #tpu.memory_space<vmem>>, vector<8x128xf32>,
    %c0_10 = arith.constant 0 : index
    %c0_11 = arith.constant 0 : index
    %12 = vector.load %arg3[%c0_10, %c0_11] : memref<8x32xf32, #tpu.memory_space<vmem>>, vector<8x32xf32>
    %c0_12 = arith.constant 0 : index
    %c0_13 = arith.constant 0 : index
    %13 = vector.load %arg14[%c0_12, %c0_13] : memref<32x128xf32, #tpu.memory_space<vmem>>, vector<32x128xf32>
    %cst_14 = arith.constant dense<0.000000e+00> : vector<8x128xf32>
    %14 = tpu.matmul %12, %13, %cst_14 {dimension_numbers = #tpu.dot_dimension_numbers<[1], [0], [0], [1], [0, 0, 1, 1], [], []>} : vector<8x32xf32>, vector<32x128xf32>, vector<8x128xf32> -> vector<8x128xf32>
    %15 = vector.extract_strided_slice %0 {offsets = [0, 0], sizes = [8, 1], strides = [1, 1]} : vector<8x3xf32> to vector<8x1xf32>
    %16 = vector.broadcast %15 : vector<8x1xf32> to vector<8x128xf32>
    %17 = arith.addf %14, %16 : vector<8x128xf32>
    %cst_15 = arith.constant 0.000000e+00 : f32
    %18 = vector.broadcast %cst_15 : f32 to vector<8x128xf32>
    %19 = arith.cmpf ogt, %17, %18 : vector<8x128xf32>
    %cst_16 = arith.constant 0.000000e+00 : f32
    %20 = vector.broadcast %cst_16 : f32 to vector<8x128xf32>
    %21 = arith.minimumf %17, %20 : vector<8x128xf32>
    %22 = math.exp %21 : vector<8x128xf32>
    %cst_17 = arith.constant 1.000000e+00 : f32
    %23 = vector.broadcast %cst_17 : f32 to vector<8x128xf32>
    %24 = arith.subf %22, %23 : vector<8x128xf32>
    %25 = arith.select %19, %17, %24 : vector<8x128xi1>, vector<8x128xf32>
    %c0_18 = arith.constant 0 : index
    %c0_19 = arith.constant 0 : index
    %26 = vector.load %arg4[%c0_18, %c0_19] : memref<128x256xf32, #tpu.memory_space<vmem>>, vector<128x256xf32>
    %cst_20 = arith.constant dense<0.000000e+00> : vector<8x256xf32>
    %27 = tpu.matmul %25, %26, %cst_20 {dimension_numbers = #tpu.dot_dimension_numbers<[1], [0], [0], [1], [0, 0, 1, 1], [], []>} : vector<8x128xf32>, vector<128x256xf32>, vector<8x256xf32> -> vector<8x256xf32>
    %c0_21 = arith.constant 0 : index
    %c0_22 = arith.constant 0 : index
    %28 = vector.load %arg5[%c0_21, %c0_22] : memref<8x256xf32, #tpu.memory_space<vmem>>, vector<8x256xf32>
    %29 = arith.mulf %27, %28 : vector<8x256xf32>
    %c0_23 = arith.constant 0 : index
    %c0_24 = arith.constant 0 : index
    %30 = vector.load %arg6[%c0_23, %c0_24] : memref<8x8xf32, #tpu.memory_space<vmem>>, vector<8x8xf32>
    %cst_25 = arith.constant dense<0.000000e+00> : vector<8x256xf32>
    %31 = tpu.matmul %30, %29, %cst_25 {dimension_numbers = #tpu.dot_dimension_numbers<[1], [0], [0], [1], [0, 0, 1, 1], [], []>} : vector<8x8xf32>, vector<8x256xf32>, vector<8x256xf32> -> vector<8x256xf32>
    %c0_26 = arith.constant 0 : index
    %c0_27 = arith.constant 0 : index
    %32 = vector.load %arg7[%c0_26, %c0_27] : memref<256x32xf32, #tpu.memory_space<vmem>>, vector<256x32xf32>
    %cst_28 = arith.constant dense<0.000000e+00> : vector<8x32xf32>
    %33 = tpu.matmul %31, %32, %cst_28 {dimension_numbers = #tpu.dot_dimension_numbers<[1], [0], [0], [1], [0, 0, 1, 1], [], []>} : vector<8x256xf32>, vector<256x32xf32>, vector<8x32xf32> -> vector<8x32xf32>
    %34 = vector.extract_strided_slice %0 {offsets = [0, 1], sizes = [8, 1], strides = [1, 1]} : vector<8x3xf32> to vector<8x1xf32>
    %35 = vector.broadcast %34 : vector<8x1xf32> to vector<8x32xf32>
    %36 = arith.addf %33, %35 : vector<8x32xf32>
    %cst_29 = arith.constant 0.000000e+00 : f32
    %37 = vector.broadcast %cst_29 : f32 to vector<8x32xf32>
    %38 = arith.cmpf ogt, %36, %37 : vector<8x32xf32>
    %cst_30 = arith.constant 0.000000e+00 : f32
    %39 = vector.broadcast %cst_30 : f32 to vector<8x32xf32>
    %40 = arith.minimumf %36, %39 : vector<8x32xf32>
    %41 = math.exp %40 : vector<8x32xf32>
    %cst_31 = arith.constant 1.000000e+00 : f32
    %42 = vector.broadcast %cst_31 : f32 to vector<8x32xf32>
    %43 = arith.subf %41, %42 : vector<8x32xf32>
    %44 = arith.select %38, %36, %43 : vector<8x32xi1>, vector<8x32xf32>
    %c0_32 = arith.constant 0 : index
    %c0_33 = arith.constant 0 : index
    %45 = vector.load %arg8[%c0_32, %c0_33] : memref<64x8xf32, #tpu.memory_space<vmem>>, vector<64x8xf32>
    %cst_34 = arith.constant dense<0.000000e+00> : vector<64x32xf32>
    %46 = tpu.matmul %45, %44, %cst_34 {dimension_numbers = #tpu.dot_dimension_numbers<[1], [0], [0], [1], [0, 0, 1, 1], [], []>} : vector<64x8xf32>, vector<8x32xf32>, vector<64x32xf32> -> vector<64x32xf32>
    %c0_35 = arith.constant 0 : index
    %c0_36 = arith.constant 0 : index
    %47 = vector.load %arg9[%c0_35, %c0_36] : memref<64x32xf32, #tpu.memory_space<vmem>>, vector<64x32xf32>
    %48 = arith.mulf %46, %47 : vector<64x32xf32>
    %c0_37 = arith.constant 0 : index
    %c0_38 = arith.constant 0 : index
    %49 = vector.load %arg10[%c0_37, %c0_38] : memref<4x64xf32, #tpu.memory_space<vmem>>, vector<4x64xf32>
    %cst_39 = arith.constant dense<0.000000e+00> : vector<4x32xf32>
    %50 = tpu.matmul %49, %48, %cst_39 {dimension_numbers = #tpu.dot_dimension_numbers<[1], [0], [0], [1], [0, 0, 1, 1], [], []>} : vector<4x64xf32>, vector<64x32xf32>, vector<4x32xf32> -> vector<4x32xf32>
    %c0_40 = arith.constant 0 : index
    %c0_41 = arith.constant 0 : index
    %51 = vector.load %arg11[%c0_40, %c0_41] : memref<32x2xf32, #tpu.memory_space<vmem>>, vector<32x2xf32>
    %cst_42 = arith.constant dense<0.000000e+00> : vector<4x2xf32>
    %52 = tpu.matmul %50, %51, %cst_42 {dimension_numbers = #tpu.dot_dimension_numbers<[1], [0], [0], [1], [0, 0, 1, 1], [], []>} : vector<4x32xf32>, vector<32x2xf32>, vector<4x2xf32> -> vector<4x2xf32>
    %53 = vector.extract_strided_slice %0 {offsets = [0, 2], sizes = [4, 1], strides = [1, 1]} : vector<8x3xf32> to vector<4x1xf32>
    %54 = vector.broadcast %53 : vector<4x1xf32> to vector<4x2xf32>
    %55 = arith.addf %52, %54 : vector<4x2xf32>
    %c0_43 = arith.constant 0 : index
    %c0_44 = arith.constant 0 : index
    %56 = vector.load %arg13[%c0_43, %c0_44] : memref<4x2xf32, #tpu.memory_space<vmem>>, vector<4x2xf32>
    tpu.vector_store %arg13[%c0_43, %c0_44], %55 {strides = array<i32>} : memref<4x2xf32, #tpu.memory_space<vmem>>, vector<4x2xf32>,
    return
  }
  func.func @transform_0(%arg0: i32) -> (i32, i32) {
    %c0_i32 = arith.constant 0 : i32
    %c0_i32_0 = arith.constant 0 : i32
    %c0_i32_1 = arith.constant 0 : i32
    return %c0_i32, %c0_i32_0 : i32, i32
  }
  func.func @transform_1(%arg0: i32) -> (i32, i32) {
    %c0_i32 = arith.constant 0 : i32
    %c0_i32_0 = arith.constant 0 : i32
    %c0_i32_1 = arith.constant 0 : i32
    return %c0_i32, %c0_i32_0 : i32, i32
  }
  func.func @transform_2(%arg0: i32) -> (i32, i32) {
    %c0_i32 = arith.constant 0 : i32
    %c0_i32_0 = arith.constant 0 : i32
    %c0_i32_1 = arith.constant 0 : i32
    return %c0_i32, %c0_i32_0 : i32, i32
  }
  func.func @transform_3(%arg0: i32) -> (i32, i32) {
    %c0_i32 = arith.constant 0 : i32
    %c0_i32_0 = arith.constant 0 : i32
    %c0_i32_1 = arith.constant 0 : i32
    return %c0_i32, %c0_i32_0 : i32, i32
  }
  func.func @transform_4(%arg0: i32) -> (i32, i32) {
    %c0_i32 = arith.constant 0 : i32
    %c0_i32_0 = arith.constant 0 : i32
    %c0_i32_1 = arith.constant 0 : i32
    return %c0_i32, %c0_i32_0 : i32, i32
  }
  func.func @transform_5(%arg0: i32) -> (i32, i32) {
    %c0_i32 = arith.constant 0 : i32
    %c0_i32_0 = arith.constant 0 : i32
    %c0_i32_1 = arith.constant 0 : i32
    return %c0_i32, %c0_i32_0 : i32, i32
  }
  func.func @transform_6(%arg0: i32) -> (i32, i32) {
    %c0_i32 = arith.constant 0 : i32
    %c0_i32_0 = arith.constant 0 : i32
    %c0_i32_1 = arith.constant 0 : i32
    return %c0_i32, %c0_i32_0 : i32, i32
  }
  func.func @transform_7(%arg0: i32) -> (i32, i32) {
    %c0_i32 = arith.constant 0 : i32
    %c0_i32_0 = arith.constant 0 : i32
    %c0_i32_1 = arith.constant 0 : i32
    return %c0_i32, %c0_i32_0 : i32, i32
  }
  func.func @transform_8(%arg0: i32) -> (i32, i32) {
    %c0_i32 = arith.constant 0 : i32
    %c0_i32_0 = arith.constant 0 : i32
    %c0_i32_1 = arith.constant 0 : i32
    return %c0_i32, %c0_i32_0 : i32, i32
  }
  func.func @transform_9(%arg0: i32) -> (i32, i32) {
    %c0_i32 = arith.constant 0 : i32
    %c0_i32_0 = arith.constant 0 : i32
    %c0_i32_1 = arith.constant 0 : i32
    return %c0_i32, %c0_i32_0 : i32, i32
  }
  func.func @transform_10(%arg0: i32) -> (i32, i32) {
    %c0_i32 = arith.constant 0 : i32
    %c0_i32_0 = arith.constant 0 : i32
    %c0_i32_1 = arith.constant 0 : i32
    return %c0_i32, %c0_i32_0 : i32, i32
  }
  func.func @transform_11(%arg0: i32) -> (i32, i32) {
    %c0_i32 = arith.constant 0 : i32
    %c0_i32_0 = arith.constant 0 : i32
    %c0_i32_1 = arith.constant 0 : i32
    return %c0_i32, %c0_i32_0 : i32, i32
  }
  func.func @transform_12(%arg0: i32) -> (i32, i32) {
    %c0_i32 = arith.constant 0 : i32
    %c0_i32_0 = arith.constant 0 : i32
    %c0_i32_1 = arith.constant 0 : i32
    return %c0_i32, %c0_i32_0 : i32, i32
  }
}

</mosaic_0001>

<bundles_post_ra>
// kernel: tpu_custom_call.1
= control target key start
LH: loop header
LB: loop body
LE: loop exit
PB: predicated region body
PF: predicated region fallthrough
CT: control target
= control target key end

     0   :  { %17 = vsyncpa [#allocation4], 0  ;;  %s762_s24 = smov [#allocation3]   ;;  %s763_s26 = smov 512   ;;  %s1142_s0 = inlined_call_operand.vmem [shape: f32[8,160], index: 0, kind: input, shape index: {}]   ;;  %s1143_s1 = inlined_call_operand.hbm [shape: f32[160,512], index: 1, kind: input, shape index: {}]   ;;  %s1144_s2 = inlined_call_operand.vmem [shape: f32[8,32], index: 2, kind: input, shape index: {}]   ;;  %s1145_s3 = inlined_call_operand.vmem [shape: f32[128,256], index: 3, kind: input, shape index: {}]   ;;  %s1146_s4 = inlined_call_operand.vmem [shape: f32[8,256], index: 4, kind: input, shape index: {}]   ;;  %s1147_s5 = inlined_call_operand.vmem [shape: f32[8,8], index: 5, kind: input, shape index: {}]   ;;  %s1148_s6 = inlined_call_operand.vmem [shape: f32[256,32], index: 6, kind: input, shape index: {}]   ;;  %s1149_s7 = inlined_call_operand.vmem [shape: f32[64,8], index: 7, kind: input, shape index: {}]   ;;  %s1150_s8 = inlined_call_operand.vmem [shape: f32[64,32], index: 8, kind: input, shape index: {}]   ;;  %s1151_s9 = inlined_call_operand.vmem [shape: f32[4,64], index: 9, kind: input, shape index: {}]   ;;  %s1152_s10 = inlined_call_operand.vmem [shape: f32[32,2], index: 10, kind: input, shape index: {}]   ;;  %s1153_s11 = inlined_call_operand.vmem [shape: f32[8,3], index: 11, kind: input, shape index: {}]   ;;  %s1154_s12 = inlined_call_operand.vmem [shape: f32[4,2], index: 12, kind: output, shape index: {}]  }
   0x1   :  { %s24_s23 = sshll.u32 %s1143_s1, 4  ;;  %s26_s25 = sshll.u32 %s762_s24, 4  ;;  %s25_s23 = int_to_ptr.hbm [resolvable:$true] %s24_s23  ;;  %s27_s25 = int_to_ptr.vmem [resolvable:$true] %s26_s25 }
   0x2   :  { %s764_s27 = smov 32  }
   0x3   :  { %32 = dma.hbm_to_vmem [thread:$0]  %s25_s23, 10240, %s27_s25, [#allocation4], %s763_s26, %s763_s26, %s764_s27  }
   0x4   :  { %760 = dma.done.wait [#allocation4], 10240  }
   0x5   :  { %761 = vsyncadd [#allocation4], 4294957056  ;;  %v136_v0 = vld [vmem:[#allocation3 + $0x260] sm:$0xff]  ;;  %v137_v1 = vld [vmem:[#allocation3 + $0x268] sm:$0xff]  ;;  %vm140_vm0 = vcmask 261120   ;;  %vm424_vm2 = vcmask 64512  }
   0x6   :  { %v132_v2 = vld [vmem:[#allocation3 + $0x240] sm:$0xff]  ;;  %176 = vmatpush.msra.mxu2 %v136_v0  ;;  %216 = vmatpush.msra.mxu3 %v137_v1  ;;  %v133_v3 = vld [vmem:[#allocation3 + $0x248] sm:$0xff]  ;;  %v122_v8 = vld [vmem:[#allocation3 + $0x1f0] sm:$0xff]  ;;  %vm640_vm4 = vcmask 523264   ;;  %vm695_vm5 = vcmask 11264  }
   0x7   :  { %v128_v4 = vld [vmem:[#allocation3 + $0x220] sm:$0xff]  ;;  %v129_v5 = vld [vmem:[#allocation3 + $0x228] sm:$0xff]  ;;  %v138_v10 = vld [vmem:[#allocation3 + $0x270] sm:$0xff]  ;;  %224 = vmatpush.msra.mxu1 %v122_v8 }
   0x8   :  { %177 = vmatpush.msra.mxu2 %v132_v2  ;;  %217 = vmatpush.msra.mxu3 %v133_v3  ;;  %v124_v6 = vld [vmem:[#allocation3 + $0x200] sm:$0xff]  ;;  %v125_v7 = vld [vmem:[#allocation3 + $0x208] sm:$0xff]  ;;  %v118_v12 = vld [vmem:[#allocation3 + $0x1d0] sm:$0xff] }
   0x9   :  { %v121_v9 = vld [vmem:[#allocation3 + $0x1e8] sm:$0xff]  ;;  %v134_v14 = vld [vmem:[#allocation3 + $0x250] sm:$0xff]  ;;  %225 = vmatpush.msra.mxu1 %v118_v12  ;;  %v120_v21 = vld [vmem:[#allocation3 + $0x1e0] sm:$0xff] }
   0xa   :  { %178 = vmatpush.msra.mxu2 %v128_v4  ;;  %218 = vmatpush.msra.mxu3 %v129_v5  ;;  %v839_v11 = vld [vmem:[%s1142_s0 + $0x8] sm:$0xff]  ;;  %v114_v15 = vld [vmem:[#allocation3 + $0x1b0] sm:$0xff]  ;;  %v123_v22 = vld [vmem:[#allocation3 + $0x1f8] sm:$0xff] }
   0xb   :  { %v117_v13 = vld [vmem:[#allocation3 + $0x1c8] sm:$0xff]  ;;  %v130_v17 = vld [vmem:[#allocation3 + $0x230] sm:$0xff]  ;;  %226 = vmatpush.msra.mxu1 %v114_v15  ;;  %144 = vmatpush.msra.mxu0 %v120_v21  ;;  %v116_v25 = vld [vmem:[#allocation3 + $0x1c0] sm:$0xff] }
   0xc   :  { %179 = vmatpush.msra.mxu2 %v124_v6  ;;  %219 = vmatpush.msra.mxu3 %v125_v7  ;;  %v113_v16 = vld [vmem:[#allocation3 + $0x1a8] sm:$0xff]  ;;  %v110_v18 = vld [vmem:[#allocation3 + $0x190] sm:$0xff]  ;;  %v119_v26 = vld [vmem:[#allocation3 + $0x1d8] sm:$0xff] }
   0xd   :  { %703 = vmatmul.msk.f32.vlgmr.msra.gmra.mxu3 %vm140_vm0, %v839_v11  ;;  %v109_v19 = vld [vmem:[#allocation3 + $0x188] sm:$0xff]  ;;  %v126_v20 = vld [vmem:[#allocation3 + $0x210] sm:$0xff]  ;;  %702 = vmatmul.msk.f32.vlgmr.msra.gmra.mxu2 %vm140_vm0, %v839_v11  ;;  %v112_v29 = vld [vmem:[#allocation3 + $0x1a0] sm:$0xff] }
   0xe   :  { %184 = vmatpush.msrb.mxu2 %v121_v9  ;;  %256 = vmatpush.msrb.mxu3 %v138_v10  ;;  %v106_v23 = vld [vmem:[#allocation3 + $0x170] sm:$0xff]  ;;  %v105_v24 = vld [vmem:[#allocation3 + $0x168] sm:$0xff]  ;;  %v115_v30 = vld [vmem:[#allocation3 + $0x1b8] sm:$0xff] }
   0xf   :  { %227 = vmatpush.msra.mxu1 %v110_v18  ;;  %v102_v27 = vld [vmem:[#allocation3 + $0x150] sm:$0xff]  ;;  %v101_v28 = vld [vmem:[#allocation3 + $0x148] sm:$0xff]  ;;  %145 = vmatpush.msra.mxu0 %v116_v25  ;;  %v108_v33 = vld [vmem:[#allocation3 + $0x180] sm:$0xff] }
  0x10   :  { %185 = vmatpush.msrb.mxu2 %v117_v13  ;;  %257 = vmatpush.msrb.mxu3 %v134_v14  ;;  %v98_v31 = vld [vmem:[#allocation3 + $0x130] sm:$0xff]  ;;  %v97_v32 = vld [vmem:[#allocation3 + $0x128] sm:$0xff]  ;;  %v111_v34 = vld [vmem:[#allocation3 + $0x198] sm:$0xff] }
  0x11   :  { %228 = vmatpush.msra.mxu1 %v106_v23  ;;  %v94_v35 = vld [vmem:[#allocation3 + $0x110] sm:$0xff]  ;;  %146 = vmatpush.msra.mxu0 %v112_v29  ;;  %v93_v36 = vld [vmem:[#allocation3 + $0x108] sm:$0xff]  ;;  %v104_v37 = vld [vmem:[#allocation3 + $0x160] sm:$0xff]  ;;  %v765_v23 = vmov 0  }
  0x12   :  { %186 = vmatpush.msrb.mxu2 %v113_v16  ;;  %258 = vmatpush.msrb.mxu3 %v130_v17  ;;  %v107_v38 = vld [vmem:[#allocation3 + $0x178] sm:$0xff]  ;;  %v90_v39 = vld [vmem:[#allocation3 + $0xf0] sm:$0xff]  ;;  %v89_v40 = vld [vmem:[#allocation3 + $0xe8] sm:$0xff] }
  0x13   :  { %229 = vmatpush.msra.mxu1 %v102_v27  ;;  %147 = vmatpush.msra.mxu0 %v108_v33  ;;  %v100_v41 = vld [vmem:[#allocation3 + $0x140] sm:$0xff]  ;;  %v103_v42 = vld [vmem:[#allocation3 + $0x158] sm:$0xff]  ;;  %v86_v43 = vld [vmem:[#allocation3 + $0xd0] sm:$0xff] }
  0x14   :  { %187 = vmatpush.msrb.mxu2 %v109_v19  ;;  %259 = vmatpush.msrb.mxu3 %v126_v20  ;;  %v85_v44 = vld [vmem:[#allocation3 + $0xc8] sm:$0xff]  ;;  %v96_v45 = vld [vmem:[#allocation3 + $0x120] sm:$0xff]  ;;  %v99_v46 = vld [vmem:[#allocation3 + $0x138] sm:$0xff] }
  0x15   :  { %230 = vmatpush.msra.mxu1 %v98_v31  ;;  %148 = vmatpush.msra.mxu0 %v104_v37  ;;  %v82_v47 = vld [vmem:[#allocation3 + $0xb0] sm:$0xff]  ;;  %v81_v48 = vld [vmem:[#allocation3 + $0xa8] sm:$0xff]  ;;  %v95_v49 = vld [vmem:[#allocation3 + $0x118] sm:$0xff] }
  0x16   :  { %264 = vmatpush.msra.mxu3 %v123_v22  ;;  %188 = vmatpush.msrb.mxu2 %v105_v24  ;;  %v78_v50 = vld [vmem:[#allocation3 + $0x90] sm:$0xff]  ;;  %v77_v51 = vld [vmem:[#allocation3 + $0x88] sm:$0xff]  ;;  %v92_v52 = vld [vmem:[#allocation3 + $0x100] sm:$0xff] }
  0x17   :  { %231 = vmatpush.msra.mxu1 %v94_v35  ;;  %149 = vmatpush.msra.mxu0 %v100_v41  ;;  %v91_v53 = vld [vmem:[#allocation3 + $0xf8] sm:$0xff]  ;;  %v74_v54 = vld [vmem:[#allocation3 + $0x70] sm:$0xff]  ;;  %v73_v55 = vld [vmem:[#allocation3 + $0x68] sm:$0xff] }
  0x18   :  { %265 = vmatpush.msra.mxu3 %v119_v26  ;;  %189 = vmatpush.msrb.mxu2 %v101_v28  ;;  %v88_v56 = vld [vmem:[#allocation3 + $0xe0] sm:$0xff]  ;;  %v87_v57 = vld [vmem:[#allocation3 + $0xd8] sm:$0xff]  ;;  %v70_v58 = vld [vmem:[#allocation3 + $0x50] sm:$0xff] }
  0x19   :  { %232 = vmatpush.msra.mxu1 %v90_v39  ;;  %150 = vmatpush.msra.mxu0 %v96_v45  ;;  %v69_v59 = vld [vmem:[#allocation3 + $0x48] sm:$0xff]  ;;  %v84_v60 = vld [vmem:[#allocation3 + $0xc0] sm:$0xff]  ;;  %v83_v61 = vld [vmem:[#allocation3 + $0xb8] sm:$0xff] }
  0x1a   :  { %266 = vmatpush.msra.mxu3 %v115_v30  ;;  %190 = vmatpush.msrb.mxu2 %v97_v32  ;;  %v66_v62 = vld [vmem:[#allocation3 + $0x30] sm:$0xff]  ;;  %v65_v63 = vld [vmem:[#allocation3 + $0x28] sm:$0xff]  ;;  %v80_v0 = vld [vmem:[#allocation3 + $0xa0] sm:$0xff] }
  0x1b   :  { %233 = vmatpush.msra.mxu1 %v86_v43  ;;  %704 = vmatmul.msk.f32.vlgmr.msrb.gmra.mxu3 %vm140_vm0, %v839_v11  ;;  %v79_v1 = vld [vmem:[#allocation3 + $0x98] sm:$0xff]  ;;  %v62_v2 = vld [vmem:[#allocation3 + $0x10] sm:$0xff]  ;;  %v61_v3 = vld [vmem:[#allocation3 + $0x8] sm:$0xff] }
  0x1c   :  { %267 = vmatpush.msra.mxu3 %v111_v34  ;;  %191 = vmatpush.msrb.mxu2 %v93_v36  ;;  %v58_v4 = vld [vmem:[%s1142_s0] sm:$0xff]  ;;  %v75_v5 = vld [vmem:[#allocation3 + $0x78] sm:$0xff]  ;;  %v377_v21 = vld [vmem:[%s1145_s3 + $0xf0] sm:$0xff] }
  0x1d   :  { %234 = vmatpush.msra.mxu1 %v82_v47  ;;  %151 = vmatpush.msra.mxu0 %v92_v52  ;;  %v76_v6 = vld [vmem:[#allocation3 + $0x80] sm:$0xff]  ;;  %v71_v7 = vld [vmem:[#allocation3 + $0x58] sm:$0xff]  ;;  %v376_v24 = vld [vmem:[%s1145_s3 + $0xe8] sm:$0xff] }
  0x1e   :  { %268 = vmatpush.msra.mxu3 %v107_v38  ;;  %192 = vmatpush.msrb.mxu2 %v89_v40  ;;  %v72_v8 = vld [vmem:[#allocation3 + $0x60] sm:$0xff]  ;;  %v67_v9 = vld [vmem:[#allocation3 + $0x38] sm:$0xff]  ;;  %v373_v25 = vld [vmem:[%s1145_s3 + $0xd0] sm:$0xff] }
  0x1f   :  { %235 = vmatpush.msra.mxu1 %v78_v50  ;;  %152 = vmatpush.msra.mxu0 %v88_v56  ;;  %v68_v10 = vld [vmem:[#allocation3 + $0x40] sm:$0xff]  ;;  %v63_v12 = vld [vmem:[#allocation3 + $0x18] sm:$0xff]  ;;  %v372_v29 = vld [vmem:[%s1145_s3 + $0xc8] sm:$0xff] }
  0x20   :  { %269 = vmatpush.msra.mxu3 %v103_v42  ;;  %193 = vmatpush.msrb.mxu2 %v85_v44  ;;  %v64_v13 = vld [vmem:[#allocation3 + $0x20] sm:$0xff]  ;;  %v139_v14 = vld [vmem:[#allocation3 + $0x278] sm:$0xff]  ;;  %v369_v30 = vld [vmem:[%s1145_s3 + $0xb0] sm:$0xff] }
  0x21   :  { %236 = vmatpush.msra.mxu1 %v74_v54  ;;  %153 = vmatpush.msra.mxu0 %v84_v60  ;;  %v60_v15 = vld [vmem:[#allocation3] sm:$0xff]  ;;  %v135_v16 = vld [vmem:[#allocation3 + $0x258] sm:$0xff]  ;;  %v368_v33 = vld [vmem:[%s1145_s3 + $0xa8] sm:$0xff] }
  0x22   :  { %270 = vmatpush.msra.mxu3 %v99_v46  ;;  %194 = vmatpush.msrb.mxu2 %v81_v48  ;;  %v131_v17 = vld [vmem:[#allocation3 + $0x238] sm:$0xff]  ;;  %v855_v20 = vld [vmem:[%s1153_s11] sm:$0xff]  ;;  %v365_v34 = vld [vmem:[%s1145_s3 + $0x90] sm:$0xff] }
  0x23   :  { %237 = vmatpush.msra.mxu1 %v70_v58  ;;  %154 = vmatpush.msra.mxu0 %v80_v0  ;;  %v127_v18 = vld [vmem:[#allocation3 + $0x218] sm:$0xff]  ;;  %v371_v28 = vld [vmem:[%s1145_s3 + $0xc0] sm:$0xff]  ;;  %v364_v48 = vld [vmem:[%s1145_s3 + $0x88] sm:$0xff] }
  0x24   :  { %271 = vmatpush.msra.mxu3 %v95_v49  ;;  %195 = vmatpush.msrb.mxu2 %v77_v51  ;;  %v378_v22 = vld [vmem:[%s1145_s3 + $0xf8] sm:$0xff]  ;;  %v367_v32 = vld [vmem:[%s1145_s3 + $0xa0] sm:$0xff]  ;;  %v361_v49 = vld [vmem:[%s1145_s3 + $0x70] sm:$0xff] }
  0x25   :  { %238 = vmatpush.msra.mxu1 %v66_v62  ;;  %155 = vmatpush.msra.mxu0 %v76_v6  ;;  %v374_v26 = vld [vmem:[%s1145_s3 + $0xd8] sm:$0xff]  ;;  %v308_v46 = vld [vmem:[%s1144_s2] sm:$0xff]  ;;  %v360_v52 = vld [vmem:[%s1145_s3 + $0x68] sm:$0xff] }
  0x26   :  { %272 = vmatpush.msra.mxu3 %v91_v53  ;;  %196 = vmatpush.msrb.mxu2 %v73_v55  ;;  %v370_v31 = vld [vmem:[%s1145_s3 + $0xb8] sm:$0xff]  ;;  %v363_v47 = vld [vmem:[%s1145_s3 + $0x80] sm:$0xff]  ;;  %v357_v53 = vld [vmem:[%s1145_s3 + $0x50] sm:$0xff] }
  0x27   :  { %239 = vmatpush.msra.mxu1 %v62_v2  ;;  %156 = vmatpush.msra.mxu0 %v72_v8  ;;  %v366_v35 = vld [vmem:[%s1145_s3 + $0x98] sm:$0xff]  ;;  %v359_v51 = vld [vmem:[%s1145_s3 + $0x60] sm:$0xff]  ;;  %v356_v56 = vld [vmem:[%s1145_s3 + $0x48] sm:$0xff] }
  0x28   :  { %273 = vmatpush.msra.mxu3 %v87_v57  ;;  %197 = vmatpush.msrb.mxu2 %v69_v59  ;;  %v362_v50 = vld [vmem:[%s1145_s3 + $0x78] sm:$0xff]  ;;  %v355_v55 = vld [vmem:[%s1145_s3 + $0x40] sm:$0xff]  ;;  %v353_v57 = vld [vmem:[%s1145_s3 + $0x30] sm:$0xff] }
  0x29   :  { %240 = vmatmul.f32.vlgmr.msra.gmra.mxu1 %v58_v4  ;;  %157 = vmatpush.msra.mxu0 %v68_v10  ;;  %v358_v54 = vld [vmem:[%s1145_s3 + $0x58] sm:$0xff]  ;;  %v351_v59 = vld [vmem:[%s1145_s3 + $0x20] sm:$0xff]  ;;  %v352_v60 = vld [vmem:[%s1145_s3 + $0x28] sm:$0xff] }
  0x2a   :  { %274 = vmatpush.msra.mxu3 %v83_v61  ;;  %198 = vmatpush.msrb.mxu2 %v65_v63  ;;  %v354_v58 = vld [vmem:[%s1145_s3 + $0x38] sm:$0xff]  ;;  %v349_v61 = vld [vmem:[%s1145_s3 + $0x10] sm:$0xff]  ;;  %v347_v63 = vld [vmem:[%s1145_s3] sm:$0xff] }
  0x2b   :  { %158 = vmatpush.msra.mxu0 %v64_v13  ;;  %728 = vset.pattern.permute.xlu0 %v765_v23  ;;  %v350_v62 = vld [vmem:[%s1145_s3 + $0x18] sm:$0xff]  ;;  %v348_v0 = vld [vmem:[%s1145_s3 + $0x8] sm:$0xff]  ;;  %v482_v10 = vld [vmem:[%s1148_s6 + $0x70] sm:$0xff] }
  0x2c   :  { %275 = vmatpush.msra.mxu3 %v79_v1  ;;  %199 = vmatpush.msrb.mxu2 %v61_v3  ;;  %v480_v13 = vld [vmem:[%s1148_s6 + $0x60] sm:$0xff]  ;;  %v473_v23 = vld [vmem:[%s1148_s6 + $0x28] sm:$0xff] }
  0x2d   :  { %200 = vmatmul.f32.vlgmr.msrb.gmra.mxu2 %v58_v4  ;;  %159 = vmatpush.msra.mxu0 %v60_v15  ;;  %v478_v15 = vld [vmem:[%s1148_s6 + $0x50] sm:$0xff] }
  0x2e   :  { %276 = vmatpush.msra.mxu3 %v75_v5  ;;  %160 = vmatmul.f32.vlgmr.msra.gmra.mxu0 %v58_v4 }
  0x2f   :  { %379 = vmatpush.msrb.mxu0 %v377_v21  ;;  %315 = vperm.xlu0 %728, %v855_v20   ;;  %v419_v21 = vld [vmem:[%s1146_s4] sm:$0xff] }
  0x30   :  { %277 = vmatpush.msra.mxu3 %v71_v7  ;;  %399 = vmatpush.msrb.mxu1 %v378_v22  ;;  %v420_v22 = vld [vmem:[%s1146_s4 + $0x8] sm:$0xff] }
  0x32   :  { %278 = vmatpush.msra.mxu3 %v67_v9  ;;  %400 = vmatpush.msrb.mxu1 %v376_v24  ;;  %v483_v9 = vld [vmem:[%s1148_s6 + $0x78] sm:$0xff] }
  0x34   :  { %279 = vmatpush.msra.mxu3 %v63_v12  ;;  %401 = vmatpush.msrb.mxu1 %v374_v26  ;;  %v481_v12 = vld [vmem:[%s1148_s6 + $0x68] sm:$0xff] }
  0x35   :  { %280 = vmatmul.f32.vlgmr.msra.gmra.mxu3 %v58_v4 }
  0x36   :  { %296 = vmatpush.msrb.mxu3 %v139_v14  ;;  %402 = vmatpush.msrb.mxu1 %v372_v29  ;;  %v479_v14 = vld [vmem:[%s1148_s6 + $0x58] sm:$0xff] }
  0x37   :  { %v471_v29 = vld [vmem:[%s1148_s6 + $0x18] sm:$0xff] }
  0x38   :  { %297 = vmatpush.msrb.mxu3 %v135_v16  ;;  %403 = vmatpush.msrb.mxu1 %v370_v31  ;;  %v477_v16 = vld [vmem:[%s1148_s6 + $0x48] sm:$0xff]  ;;  %v470_v31 = vld [vmem:[%s1148_s6 + $0x10] sm:$0xff] }
  0x3a   :  { %298 = vmatpush.msrb.mxu3 %v131_v17  ;;  %404 = vmatpush.msrb.mxu1 %v368_v33  ;;  %v476_v17 = vld [vmem:[%s1148_s6 + $0x40] sm:$0xff]  ;;  %v469_v33 = vld [vmem:[%s1148_s6 + $0x8] sm:$0xff] }
  0x3c   :  { %299 = vmatpush.msrb.mxu3 %v127_v18  ;;  %405 = vmatpush.msrb.mxu1 %v366_v35  ;;  %v475_v18 = vld [vmem:[%s1148_s6 + $0x38] sm:$0xff]  ;;  %v496_v35 = vld [vmem:[%s1148_s6 + $0xe0] sm:$0xff] }
  0x3d   :  { %705 = vmatmul.msk.f32.vlgmr.msrb.gmra.mxu3 %vm140_vm0, %v839_v11  ;;  %v375_v11 = vld [vmem:[%s1145_s3 + $0xe0] sm:$0xff] }
  0x3e   :  { %380 = vmatpush.msrb.mxu0 %v375_v11  ;;  %406 = vmatpush.msrb.mxu1 %v364_v48  ;;  %v484_v48 = vld [vmem:[%s1148_s6 + $0x80] sm:$0xff] }
  0x3f   :  { %504 = vmatpush.msra.mxu3 %v483_v9 }
  0x40   :  { %381 = vmatpush.msrb.mxu0 %v373_v25  ;;  %407 = vmatpush.msrb.mxu1 %v362_v50  ;;  %v472_v25 = vld [vmem:[%s1148_s6 + $0x20] sm:$0xff] }
  0x41   :  { %505 = vmatpush.msra.mxu3 %v482_v10  ;;  %v667_v10 = vld [vmem:[%s1152_s10 + $0x18] sm:$0xff] }
  0x42   :  { %382 = vmatpush.msrb.mxu0 %v371_v28  ;;  %408 = vmatpush.msrb.mxu1 %v360_v52  ;;  %v423_v28 = vld [vmem:[%s1147_s5] sm:$0xff] }
  0x43   :  { %506 = vmatpush.msra.mxu3 %v481_v12  ;;  %v666_v12 = vld [vmem:[%s1152_s10 + $0x10] sm:$0xff] }
  0x44   :  { %383 = vmatpush.msrb.mxu0 %v369_v30  ;;  %409 = vmatpush.msrb.mxu1 %v358_v54  ;;  %v499_v30 = vld [vmem:[%s1148_s6 + $0xf8] sm:$0xff] }
  0x45   :  { %507 = vmatpush.msra.mxu3 %v480_v13  ;;  %v665_v13 = vld [vmem:[%s1152_s10 + $0x8] sm:$0xff] }
  0x46   :  { %384 = vmatpush.msrb.mxu0 %v367_v32  ;;  %410 = vmatpush.msrb.mxu1 %v356_v56  ;;  %v498_v32 = vld [vmem:[%s1148_s6 + $0xf0] sm:$0xff] }
  0x47   :  { %508 = vmatpush.msra.mxu3 %v479_v14  ;;  %v664_v14 = vld [vmem:[%s1152_s10] sm:$0xff] }
  0x48   :  { %385 = vmatpush.msrb.mxu0 %v365_v34  ;;  %411 = vmatpush.msrb.mxu1 %v354_v58  ;;  %v497_v34 = vld [vmem:[%s1148_s6 + $0xe8] sm:$0xff] }
  0x49   :  { %509 = vmatpush.msra.mxu3 %v478_v15 }
  0x4a   :  { %386 = vmatpush.msrb.mxu0 %v363_v47  ;;  %412 = vmatpush.msrb.mxu1 %v352_v60  ;;  %v485_v47 = vld [vmem:[%s1148_s6 + $0x88] sm:$0xff] }
  0x4b   :  { %510 = vmatpush.msra.mxu3 %v477_v16 }
  0x4c   :  { %387 = vmatpush.msrb.mxu0 %v361_v49  ;;  %413 = vmatpush.msrb.mxu1 %v350_v62  ;;  %v766_v49 = vmov 1   ;;  %v550_v62 = vld [vmem:[%s1149_s7] sm:$0xff] }
  0x4d   :  { %511 = vmatpush.msra.mxu3 %v476_v17  ;;  %729 = vset.pattern.permute.xlu0 %v766_v49  ;;  %v630_v17 = vld [vmem:[%s1150_s8 + $0x38] sm:$0xff] }
  0x4e   :  { %388 = vmatpush.msrb.mxu0 %v359_v51  ;;  %414 = vmatpush.msrb.mxu1 %v348_v0  ;;  %v555_v0 = vld [vmem:[%s1149_s7 + $0x28] sm:$0xff] }
  0x4f   :  { %512 = vmatpush.msra.mxu3 %v475_v18  ;;  %501 = vperm.xlu0 %729, %v855_v20   ;;  %v629_v18 = vld [vmem:[%s1150_s8 + $0x30] sm:$0xff] }
  0x50   :  { %389 = vmatpush.msrb.mxu0 %v357_v53 }
  0x52   :  { %390 = vmatpush.msrb.mxu0 %v355_v55 }
  0x54   :  { %391 = vmatpush.msrb.mxu0 %v353_v57 }
  0x56   :  { %392 = vmatpush.msrb.mxu0 %v351_v59 }
  0x58   :  { %393 = vmatpush.msrb.mxu0 %v349_v61  ;;  %v554_v61 = vld [vmem:[%s1149_s7 + $0x20] sm:$0xff] }
  0x5a   :  { %394 = vmatpush.msrb.mxu0 %v347_v63 }
  0x90   :  { %v221_v19 = vpop.f32.mrf.mxu3  ;;  %v181_v36 = vpop.f32.mrf.mxu2 }
  0x9e   :  { %v261_v27 = vpop.f32.mrf.mxu3 }
  0xa1   :  { %v316_v1 = vpop.permute.xlu0 %315 }
  0xa6   :  { %v241_v38 = vpop.f32.mrf.mxu1 }
  0xa7   :  { %v262_v42 = vadd.f32 %v261_v27, %v241_v38  ;;  %v493_v38 = vld [vmem:[%s1148_s6 + $0xc8] sm:$0xff] }
  0xab   :  { %v161_v43 = vpop.f32.mrf.mxu0 }
  0xac   :  { %v182_v45 = vadd.f32 %v181_v36, %v161_v43  ;;  %v495_v36 = vld [vmem:[%s1148_s6 + $0xd8] sm:$0xff]  ;;  %v468_v43 = vld [vmem:[%s1148_s6] sm:$0xff] }
  0xb0   :  { %v201_v41 = vpop.f32.mrf.mxu2 }
  0xb1   :  { %v222_v44 = vadd.f32 %v221_v19, %v201_v41  ;;  %v474_v19 = vld [vmem:[%s1148_s6 + $0x30] sm:$0xff] }
  0xb2   :  { %513 = vmatpush.msra.mxu3 %v474_v19  ;;  %v490_v41 = vld [vmem:[%s1148_s6 + $0xb0] sm:$0xff] }
  0xb4   :  { %514 = vmatpush.msra.mxu3 %v473_v23 }
  0xb6   :  { %515 = vmatpush.msra.mxu3 %v472_v25  ;;  %v626_v25 = vld [vmem:[%s1150_s8 + $0x18] sm:$0xff] }
  0xb8   :  { %v281_v37 = vpop.f32.mrf.mxu3  ;;  %516 = vmatpush.msra.mxu3 %v471_v29  ;;  %v625_v29 = vld [vmem:[%s1150_s8 + $0x10] sm:$0xff] }
  0xba   :  { %517 = vmatpush.msra.mxu3 %v470_v31 }
  0xbc   :  { %518 = vmatpush.msra.mxu3 %v469_v33 }
  0xbe   :  { %519 = vmatpush.msra.mxu3 %v468_v43 }
  0xc0   :  { %v301_v39 = vpop.f32.mrf.mxu3  ;;  %687 = vmatpush.msrb.mxu3 %v667_v10 }
  0xc1   :  { %v302_v40 = vadd.f32 %v301_v39, %v281_v37  ;;  %v494_v37 = vld [vmem:[%s1148_s6 + $0xd0] sm:$0xff]  ;;  %v492_v39 = vld [vmem:[%s1148_s6 + $0xc0] sm:$0xff]  ;;  %v502_v53 = vpop.permute.xlu0 %501 }
  0xc2   :  { %688 = vmatpush.msrb.mxu3 %v666_v12 }
  0xc3   :  { %333 = vmatpush.msra.mxu2 %v302_v40  ;;  %v491_v40 = vld [vmem:[%s1148_s6 + $0xb8] sm:$0xff] }
  0xc4   :  { %689 = vmatpush.msrb.mxu3 %v665_v13 }
  0xc5   :  { %334 = vmatpush.msra.mxu2 %v262_v42  ;;  %v489_v42 = vld [vmem:[%s1148_s6 + $0xa8] sm:$0xff] }
  0xc6   :  { %690 = vmatpush.msrb.mxu3 %v664_v14 }
  0xc7   :  { %335 = vmatpush.msra.mxu2 %v222_v44  ;;  %v488_v44 = vld [vmem:[%s1148_s6 + $0xa0] sm:$0xff] }
  0xc9   :  { %336 = vmatpush.msra.mxu2 %v182_v45  ;;  %v487_v45 = vld [vmem:[%s1148_s6 + $0x98] sm:$0xff] }
  0xca   :  { %706 = vmatmul.msk.f32.vlgmr.msra.gmra.mxu2 %vm140_vm0, %v308_v46  ;;  %v486_v46 = vld [vmem:[%s1148_s6 + $0x90] sm:$0xff] }
 0x14d   :  { %v338_v2 = vpop.f32.mrf.mxu2 }
 0x14e   :  { %v339_v3 = vadd.f32 %v338_v2, %v316_v1  ;;  %v551_v1 = vld [vmem:[%s1149_s7 + $0x8] sm:$0xff]  ;;  %v556_v2 = vld [vmem:[%s1149_s7 + $0x30] sm:$0xff] }
 0x150   :  { %v342_v4 = vmin.f32 %v339_v3, 0.0  ;;  %vm341_vm1 = vcmp.gt.f32.partialorder %v339_v3, 0.0 }
 0x152   :  { %v343_v5 = vmul.f32 1.442695, %v342_v4  ;;  %v557_v4 = vld [vmem:[%s1149_s7 + $0x38] sm:$0xff] }
 0x154   :  { %732 = vpow2.f32 %v343_v5  ;;  %v553_v5 = vld [vmem:[%s1149_s7 + $0x18] sm:$0xff] }
 0x15a   :  { %v733_v6 = vpop.eup %732 }
 0x15b   :  { %v707_v7 = vadd.f32 -1.0, %v733_v6 }
 0x15d   :  { %v346_v8 = vsel %vm341_vm1, %v339_v3, %v707_v7  ;;  %v552_v3 = vld [vmem:[%s1149_s7 + $0x10] sm:$0xff] }
 0x15e   :  { %395 = vmatmul.f32.vlgmr.msrb.gmra.mxu0 %v346_v8  ;;  %415 = vmatmul.f32.vlgmr.msrb.gmra.mxu1 %v346_v8 }
 0x1db   :  { %v396_v11 = vpop.f32.mrf.mxu0  ;;  %v416_v24 = vpop.f32.mrf.mxu1 }
 0x1dc   :  { %v421_v26 = vmul.f32 %v419_v21, %v396_v11  ;;  %v422_v27 = vmul.f32 %v420_v22, %v416_v24  ;;  %v628_v22 = vld [vmem:[%s1150_s8 + $0x28] sm:$0xff]  ;;  %v627_v11 = vld [vmem:[%s1150_s8 + $0x20] sm:$0xff] }
 0x1de   :  { %443 = vmatpush.msrb.mxu2 %v421_v26 }
 0x1df   :  { %708 = vmatmul.msk.f32.vlgmr.msrb.gmra.mxu2 %vm424_vm2, %v423_v28 }
 0x1e0   :  { %463 = vmatpush.msra.mxu2 %v422_v27 }
 0x1e2   :  { %524 = vmatpush.msrb.mxu2 %v499_v30  ;;  %v624_v30 = vld [vmem:[%s1150_s8 + $0x8] sm:$0xff] }
 0x1e4   :  { %525 = vmatpush.msrb.mxu2 %v498_v32  ;;  %v623_v32 = vld [vmem:[%s1150_s8] sm:$0xff] }
 0x1e6   :  { %526 = vmatpush.msrb.mxu2 %v497_v34 }
 0x1e7   :  { %709 = vmatmul.msk.f32.vlgmr.msra.gmra.mxu2 %vm424_vm2, %v423_v28 }
 0x1e8   :  { %527 = vmatpush.msrb.mxu2 %v496_v35  ;;  %v639_v35 = vld [vmem:[%s1151_s9] sm:$0xf] }
 0x1ea   :  { %528 = vmatpush.msrb.mxu2 %v495_v36  ;;  %v767_v36 = vmov 2  }
 0x1eb   :  { %730 = vset.pattern.permute.xlu1 %v767_v36  ;;  %731 = vset.pattern.permute.xlu0 %v767_v36 }
 0x1ec   :  { %529 = vmatpush.msrb.mxu2 %v494_v37  ;;  %669 = vperm.xlu1 %730, %v855_v20  }
 0x1ee   :  { %530 = vmatpush.msrb.mxu2 %v493_v38 }
 0x1f0   :  { %531 = vmatpush.msrb.mxu2 %v492_v39 }
 0x1f2   :  { %532 = vmatpush.msrb.mxu2 %v491_v40 }
 0x1f4   :  { %533 = vmatpush.msrb.mxu2 %v490_v41 }
 0x1f6   :  { %534 = vmatpush.msrb.mxu2 %v489_v42 }
 0x1f8   :  { %535 = vmatpush.msrb.mxu2 %v488_v44 }
 0x1fa   :  { %536 = vmatpush.msrb.mxu2 %v487_v45 }
 0x1fc   :  { %537 = vmatpush.msrb.mxu2 %v486_v46 }
 0x1fe   :  { %538 = vmatpush.msrb.mxu2 %v485_v47 }
 0x200   :  { %539 = vmatpush.msrb.mxu2 %v484_v48 }
 0x25e   :  { %v670_v38 = vpop.permute.xlu1 %669 }
 0x262   :  { %v445_v50 = vpop.f32.mrf.mxu2 }
 0x263   :  { %520 = vmatmul.f32.vlgmr.msra.gmra.mxu3 %v445_v50 }
 0x26a   :  { %v465_v51 = vpop.f32.mrf.mxu2 }
 0x26b   :  { %540 = vmatmul.f32.vlgmr.msrb.gmra.mxu2 %v465_v51 }
 0x2e6   :  { %v521_v52 = vpop.f32.mrf.mxu3 }
 0x2e7   :  { %v522_v54 = vadd.f32 %v521_v52, %v502_v53 }
 0x2ee   :  { %v541_v55 = vpop.f32.mrf.mxu2 }
 0x2ef   :  { %v542_v56 = vadd.f32 %v541_v55, %v522_v54 }
 0x2f1   :  { %v545_v57 = vmin.f32 %v542_v56, 0.0  ;;  %vm544_vm3 = vcmp.gt.f32.partialorder %v542_v56, 0.0 }
 0x2f3   :  { %v546_v58 = vmul.f32 1.442695, %v545_v57 }
 0x2f5   :  { %734 = vpow2.f32 %v546_v58 }
 0x2fb   :  { %v735_v59 = vpop.eup %734 }
 0x2fc   :  { %v710_v60 = vadd.f32 -1.0, %v735_v59 }
 0x2fe   :  { %v549_v63 = vsel %vm544_vm3, %v542_v56, %v710_v60 }
 0x2ff   :  { %597 = vmatpush.msra.mxu0 %v549_v63  ;;  %721 = vmatpush.msra.mxu1 %v549_v63 }
 0x300   :  { %715 = vmatmul.msk.f32.vlgmr.msra.gmra.mxu1 %vm424_vm2, %v554_v61  ;;  %711 = vmatmul.msk.f32.vlgmr.msra.gmra.mxu0 %vm424_vm2, %v550_v62 }
 0x308   :  { %716 = vmatmul.msk.f32.gmra.mxu1 %vm424_vm2, %v555_v0  ;;  %712 = vmatmul.msk.f32.gmra.mxu0 %vm424_vm2, %v551_v1 }
 0x310   :  { %717 = vmatmul.msk.f32.gmra.mxu1 %vm424_vm2, %v556_v2  ;;  %713 = vmatmul.msk.f32.gmra.mxu0 %vm424_vm2, %v552_v3 }
 0x318   :  { %718 = vmatmul.msk.f32.gmra.mxu1 %vm424_vm2, %v557_v4  ;;  %714 = vmatmul.msk.f32.gmra.mxu0 %vm424_vm2, %v553_v5 }
 0x37d   :  { %v611_v6 = vpop.f32.mrf.mxu1  ;;  %v599_v7 = vpop.f32.mrf.mxu0 }
 0x37e   :  { %v635_v27 = vmul.f32 %v627_v11, %v611_v6  ;;  %v631_v34 = vmul.f32 %v623_v32, %v599_v7 }
 0x385   :  { %v614_v8 = vpop.f32.mrf.mxu1  ;;  %v602_v9 = vpop.f32.mrf.mxu0 }
 0x386   :  { %v636_v26 = vmul.f32 %v628_v22, %v614_v8  ;;  %v632_v33 = vmul.f32 %v624_v30, %v602_v9 }
 0x38d   :  { %v617_v15 = vpop.f32.mrf.mxu1  ;;  %v605_v16 = vpop.f32.mrf.mxu0 }
 0x38e   :  { %v637_v23 = vmul.f32 %v629_v18, %v617_v15  ;;  %v633_v31 = vmul.f32 %v625_v29, %v605_v16 }
 0x395   :  { %v620_v19 = vpop.f32.mrf.mxu1  ;;  %v608_v24 = vpop.f32.mrf.mxu0 }
 0x396   :  { %v638_v21 = vmul.f32 %v630_v17, %v620_v19  ;;  %v634_v28 = vmul.f32 %v626_v25, %v608_v24 }
 0x398   :  { %652 = vmatpush.msrb.mxu1 %v638_v21 }
 0x39a   :  { %653 = vmatpush.msrb.mxu1 %v637_v23 }
 0x39c   :  { %654 = vmatpush.msrb.mxu1 %v636_v26 }
 0x39e   :  { %655 = vmatpush.msrb.mxu1 %v635_v27 }
 0x3a0   :  { %656 = vmatpush.msrb.mxu1 %v634_v28 }
 0x3a2   :  { %657 = vmatpush.msrb.mxu1 %v633_v31 }
 0x3a4   :  { %658 = vmatpush.msrb.mxu1 %v632_v33 }
 0x3a6   :  { %659 = vmatpush.msrb.mxu1 %v631_v34 }
 0x3a7   :  { %719 = vmatmul.msk.f32.vlgmr.msrb.gmra.mxu1 %vm640_vm4, %v639_v35 }
 0x424   :  { %v661_v37 = vpop.f32.mrf.mxu1 }
 0x425   :  { %720 = vmatmul.msk.f32.vlgmr.msrb.gmra.mxu3 %vm140_vm0, %v661_v37 }
 0x4a8   :  { %v692_v39 = vpop.f32.mrf.mxu3 }
 0x4a9   :  { %v693_v40 = vadd.f32 %v692_v39, %v670_v38 }
 0x4ab   :  { %696 = vst.msk [vmem:[%s1154_s12] sm:$0xf] %vm695_vm5, %v693_v40 }
 0x4ac   :  { %701 = vsyncpa [#allocation4], 1 }

</bundles_post_ra>
